<compile_context>
chip_gen: v6e
topology: v6e:2x2x1
jax: 0.10.0
libtpu: 0.0.40
codegen_flags: <defaults>
</compile_context>

<pallas_src>
import functools

import jax
import jax.numpy as jnp
import numpy as np
from jax import lax
from jax.experimental import pallas as pl
from jax.experimental.pallas import tpu as pltpu

_LANES = 128


def _mtlu_kernel_packed(x_ref, wb_ref, o_ref, *, bin_num, bin_width):
    # x_ref/o_ref: (nt, 1, st, 128) f32 VMEM tile for (batch tile, channel c, spatial tile)
    # wb_ref: flat (C*BinNum,) int32 SMEM table; entry = (bf16 w << 16) | bf16 b
    c = pl.program_id(1)
    x = x_ref[...]
    half = bin_num // 2
    base = c * bin_num

    # Monotone compare/select chain on the PACKED 32-bit table value:
    # idx = #{b >= 1 : x >= (b-half)*bin_width}  ==  clip(floor(x/bw)+half, 0, bin_num-1)
    packed = jnp.full(x.shape, wb_ref[base], dtype=jnp.int32)
    for b in range(1, bin_num):  # bin_num is small (20): fully unrolled
        thr = jnp.float32((b - half) * bin_width)
        packed = jnp.where(x >= thr, wb_ref[base + b], packed)

    bits = pltpu.bitcast(packed, jnp.uint32)
    w_sel = pltpu.bitcast(bits & jnp.uint32(0xFFFF0000), jnp.float32)  # bf16 w as f32
    b_sel = pltpu.bitcast(bits << 16, jnp.float32)                     # bf16 b as f32
    o_ref[...] = x * w_sel + b_sel


def _mtlu_kernel_f32(x_ref, w_ref, b_ref, o_ref, *, bin_num, bin_width):
    # Full-precision fallback: exact f32 tables, 1 compare + 2 selects per bin.
    c = pl.program_id(1)
    x = x_ref[...]
    half = bin_num // 2
    base = c * bin_num

    w_sel = jnp.full(x.shape, w_ref[base], dtype=x.dtype)
    b_sel = jnp.full(x.shape, b_ref[base], dtype=x.dtype)
    for b in range(1, bin_num):
        thr = jnp.float32((b - half) * bin_width)
        mask = x >= thr
        w_sel = jnp.where(mask, w_ref[base + b], w_sel)
        b_sel = jnp.where(mask, b_ref[base + b], b_sel)
    o_ref[...] = x * w_sel + b_sel


def _choose_tiles(n, s, elem_bytes=4, target_bytes=1 << 20, max_sublanes=2048):
    """Pick (nt, st): block (nt,1,st,128) of ~target_bytes; st multiple of 8 or == s."""
    st = s if s <= max_sublanes else max_sublanes  # full extent is exempt from /8 rule
    per_item = st * _LANES * elem_bytes
    nt = int(max(1, min(n, target_bytes // per_item)))
    return nt, st


def mtlu_forward(x, weight, bias, *, bin_num, bin_width, pack_bf16=True):
    """x: (N, C, H, W) float32; weight/bias: (C, BinNum) float32."""
    N, C, H, W = x.shape
    HW = H * W

    pad = (-HW) % _LANES
    if pad:
        # TODO(synk): ragged H*W pays one extra pad copy + output slice; a
        # full-extent-lane BlockSpec tail path would avoid it.
        xf = jnp.pad(x.reshape(N, C, HW), ((0, 0), (0, 0), (0, pad)))
    else:
        xf = x.reshape(N, C, HW)
    HWp = HW + pad
    S = HWp // _LANES
    x4 = xf.reshape(N, C, S, _LANES)  # free, contiguous

    nt, st = _choose_tiles(N, S)
    grid = (pl.cdiv(N, nt), C, pl.cdiv(S, st))
    blk = (nt, 1, st, _LANES)
    idx_map = lambda n, c, s: (n, c, s, 0)

    if pack_bf16:
        # Pack (bf16 weight | bf16 bias) into one int32 per (channel, bin) on host.
        w_hi = lax.bitcast_convert_type(weight.astype(jnp.bfloat16), jnp.uint16)
        b_lo = lax.bitcast_convert_type(bias.astype(jnp.bfloat16), jnp.uint16)
        packed = (w_hi.astype(jnp.uint32) << 16) | b_lo.astype(jnp.uint32)
        tables = (lax.bitcast_convert_type(packed, jnp.int32).reshape(-1),)
        kernel = functools.partial(_mtlu_kernel_packed, bin_num=bin_num,
                                   bin_width=bin_width)
    else:
        tables = (weight.reshape(-1), bias.reshape(-1))
        kernel = functools.partial(_mtlu_kernel_f32, bin_num=bin_num,
                                   bin_width=bin_width)

    table_specs = [pl.BlockSpec(memory_space=pltpu.MemorySpace.SMEM)] * len(tables)

    out = pl.pallas_call(
        kernel,
        out_shape=jax.ShapeDtypeStruct((N, C, S, _LANES), x.dtype),
        grid=grid,
        in_specs=[pl.BlockSpec(blk, idx_map)] + table_specs,
        out_specs=pl.BlockSpec(blk, idx_map),
        compiler_params=pltpu.CompilerParams(
            dimension_semantics=("parallel", "parallel", "parallel"),
        ),
    )(x4, *tables)

    out = out.reshape(N, C, HWp)
    if pad:
        out = out[:, :, :HW]
    return out.reshape(N, C, H, W)


def mtlu_reference(x, weight, bias, *, bin_num, bin_width):
    """Pure-JAX reference of the original module semantics (floor/clip index)."""
    N, C, H, W = x.shape
    half = bin_num // 2
    idx = jnp.clip(jnp.floor(x / bin_width).astype(jnp.int32) + half, 0, bin_num - 1)
    ch = jnp.arange(C)[None, :, None, None]
    return x * weight[ch, idx] + bias[ch, idx]


if __name__ == "__main__":
    # Module hyperparameters (FeatMapNum == number of channels).
    BinNum = 20
    BinWidth = 0.1
    FeatMapNum = 4

    key = jax.random.PRNGKey(0)
    kx, kw, kb = jax.random.split(key, 3)
    x = jax.random.normal(kx, (2, FeatMapNum, 16, 16), jnp.float32)

    # Keep random test inputs away from bin boundaries: the kernel compares
    # x >= k*BinWidth instead of computing floor(x/BinWidth), which can pick
    # the adjacent bin for x within ~1 ULP of a boundary (accepted tradeoff).
    t = x / jnp.float32(BinWidth)
    frac = jnp.abs(t - jnp.round(t))
    x = jnp.where(frac < 0.05, x + jnp.float32(0.3 * BinWidth), x)

    # --- check 1: random (trained-like) weight/bias ---
    w_rand = jax.random.normal(kw, (FeatMapNum, BinNum), jnp.float32)
    b_rand = 0.1 * jax.random.normal(kb, (FeatMapNum, BinNum), jnp.float32)

    # 1a) exact-f32 path vs exact reference
    y_f32 = mtlu_forward(x, w_rand, b_rand, bin_num=BinNum, bin_width=BinWidth,
                         pack_bf16=False)
    y_f32 = jax.block_until_ready(y_f32)
    y_ref = mtlu_reference(x, w_rand, b_rand, bin_num=BinNum, bin_width=BinWidth)
    np.testing.assert_allclose(np.asarray(y_f32), np.asarray(y_ref),
                               rtol=1e-5, atol=1e-6)

    # 1b) packed bf16-table path vs reference evaluated with bf16-rounded tables
    y_pk = mtlu_forward(x, w_rand, b_rand, bin_num=BinNum, bin_width=BinWidth,
                        pack_bf16=True)
    y_pk = jax.block_until_ready(y_pk)
    w_q = w_rand.astype(jnp.bfloat16).astype(jnp.float32)
    b_q = b_rand.astype(jnp.bfloat16).astype(jnp.float32)
    y_ref_q = mtlu_reference(x, w_q, b_q, bin_num=BinNum, bin_width=BinWidth)
    np.testing.assert_allclose(np.asarray(y_pk), np.asarray(y_ref_q),
                               rtol=1e-5, atol=1e-6)
    # bf16 table quantization stays small vs the full-precision reference
    np.testing.assert_allclose(np.asarray(y_pk), np.asarray(y_ref),
                               rtol=5e-2, atol=5e-2)

    # --- check 2: MTLU.__init__ defaults (weight[:, BinNum//2:] = 1) == ReLU ---
    half = BinNum // 2
    mtluweight = jnp.zeros((FeatMapNum, BinNum), jnp.float32).at[:, half:].set(1.0)
    mtlubias = jnp.zeros((FeatMapNum, BinNum), jnp.float32)
    y0 = mtlu_forward(x, mtluweight, mtlubias, bin_num=BinNum, bin_width=BinWidth)
    y0 = jax.block_until_ready(y0)
    np.testing.assert_allclose(np.asarray(y0), np.maximum(np.asarray(x), 0.0),
                               rtol=1e-6, atol=1e-6)
    np.testing.assert_allclose(
        np.asarray(y0),
        np.asarray(mtlu_reference(x, mtluweight, mtlubias,
                                  bin_num=BinNum, bin_width=BinWidth)),
        rtol=1e-6, atol=1e-6)

    print("KERNEL_OK")
</pallas_src>

<mosaic_0001>
module attributes {stable_mosaic.version = 11 : i64} {
  func.func @_mtlu_kernel_f32(%arg0: i32, %arg1: i32, %arg2: i32, %arg3: memref<2x1x2x128xf32, #tpu.memory_space<vmem>>, %arg4: memref<80xf32, #tpu.memory_space<smem>>, %arg5: memref<80xf32, #tpu.memory_space<smem>>, %arg6: memref<2x1x2x128xf32, #tpu.memory_space<vmem>>) attributes {dimension_semantics = [#tpu.dimension_semantics<parallel>, #tpu.dimension_semantics<parallel>, #tpu.dimension_semantics<parallel>], iteration_bounds = array<i64: 1, 4, 1>, scalar_prefetch = 0 : i64, scratch_operands = 0 : i64, tpu.core_type = #tpu.core_type<tc>, window_params = [{transform_indices = @transform_0, window_bounds = array<i64: 2, 1, 2, 128>}, {transform_indices = @transform_1, window_bounds = array<i64: 80>}, {transform_indices = @transform_2, window_bounds = array<i64: 80>}, {transform_indices = @transform_3, window_bounds = array<i64: 2, 1, 2, 128>}]} {
    %c0 = arith.constant 0 : index
    %c0_0 = arith.constant 0 : index
    %c0_1 = arith.constant 0 : index
    %c0_2 = arith.constant 0 : index
    %0 = vector.load %arg3[%c0, %c0_0, %c0_1, %c0_2] : memref<2x1x2x128xf32, #tpu.memory_space<vmem>>, vector<2x1x2x128xf32>
    %c20_i32 = arith.constant 20 : i32
    %1 = arith.muli %arg1, %c20_i32 : i32
    %2 = arith.index_cast %1 : i32 to index
    %3 = memref.load %arg4[%2] : memref<80xf32, #tpu.memory_space<smem>>
    %4 = vector.broadcast %3 : f32 to vector<2x1x2x128xf32>
    %5 = arith.index_cast %1 : i32 to index
    %6 = memref.load %arg5[%5] : memref<80xf32, #tpu.memory_space<smem>>
    %7 = vector.broadcast %6 : f32 to vector<2x1x2x128xf32>
    %cst = arith.constant -0.899999976 : f32
    %8 = vector.broadcast %cst : f32 to vector<2x1x2x128xf32>
    %9 = arith.cmpf oge, %0, %8 : vector<2x1x2x128xf32>
    %c1_i32 = arith.constant 1 : i32
    %10 = arith.addi %1, %c1_i32 : i32
    %11 = arith.index_cast %10 : i32 to index
    %12 = memref.load %arg4[%11] : memref<80xf32, #tpu.memory_space<smem>>
    %13 = vector.broadcast %12 : f32 to vector<2x1x2x128xf32>
    %14 = arith.select %9, %13, %4 : vector<2x1x2x128xi1>, vector<2x1x2x128xf32>
    %c1_i32_3 = arith.constant 1 : i32
    %15 = arith.addi %1, %c1_i32_3 : i32
    %16 = arith.index_cast %15 : i32 to index
    %17 = memref.load %arg5[%16] : memref<80xf32, #tpu.memory_space<smem>>
    %18 = vector.broadcast %17 : f32 to vector<2x1x2x128xf32>
    %19 = arith.select %9, %18, %7 : vector<2x1x2x128xi1>, vector<2x1x2x128xf32>
    %cst_4 = arith.constant -8.000000e-01 : f32
    %20 = vector.broadcast %cst_4 : f32 to vector<2x1x2x128xf32>
    %21 = arith.cmpf oge, %0, %20 : vector<2x1x2x128xf32>
    %c2_i32 = arith.constant 2 : i32
    %22 = arith.addi %1, %c2_i32 : i32
    %23 = arith.index_cast %22 : i32 to index
    %24 = memref.load %arg4[%23] : memref<80xf32, #tpu.memory_space<smem>>
    %25 = vector.broadcast %24 : f32 to vector<2x1x2x128xf32>
    %26 = arith.select %21, %25, %14 : vector<2x1x2x128xi1>, vector<2x1x2x128xf32>
    %c2_i32_5 = arith.constant 2 : i32
    %27 = arith.addi %1, %c2_i32_5 : i32
    %28 = arith.index_cast %27 : i32 to index
    %29 = memref.load %arg5[%28] : memref<80xf32, #tpu.memory_space<smem>>
    %30 = vector.broadcast %29 : f32 to vector<2x1x2x128xf32>
    %31 = arith.select %21, %30, %19 : vector<2x1x2x128xi1>, vector<2x1x2x128xf32>
    %cst_6 = arith.constant -0.699999988 : f32
    %32 = vector.broadcast %cst_6 : f32 to vector<2x1x2x128xf32>
    %33 = arith.cmpf oge, %0, %32 : vector<2x1x2x128xf32>
    %c3_i32 = arith.constant 3 : i32
    %34 = arith.addi %1, %c3_i32 : i32
    %35 = arith.index_cast %34 : i32 to index
    %36 = memref.load %arg4[%35] : memref<80xf32, #tpu.memory_space<smem>>
    %37 = vector.broadcast %36 : f32 to vector<2x1x2x128xf32>
    %38 = arith.select %33, %37, %26 : vector<2x1x2x128xi1>, vector<2x1x2x128xf32>
    %c3_i32_7 = arith.constant 3 : i32
    %39 = arith.addi %1, %c3_i32_7 : i32
    %40 = arith.index_cast %39 : i32 to index
    %41 = memref.load %arg5[%40] : memref<80xf32, #tpu.memory_space<smem>>
    %42 = vector.broadcast %41 : f32 to vector<2x1x2x128xf32>
    %43 = arith.select %33, %42, %31 : vector<2x1x2x128xi1>, vector<2x1x2x128xf32>
    %cst_8 = arith.constant -6.000000e-01 : f32
    %44 = vector.broadcast %cst_8 : f32 to vector<2x1x2x128xf32>
    %45 = arith.cmpf oge, %0, %44 : vector<2x1x2x128xf32>
    %c4_i32 = arith.constant 4 : i32
    %46 = arith.addi %1, %c4_i32 : i32
    %47 = arith.index_cast %46 : i32 to index
    %48 = memref.load %arg4[%47] : memref<80xf32, #tpu.memory_space<smem>>
    %49 = vector.broadcast %48 : f32 to vector<2x1x2x128xf32>
    %50 = arith.select %45, %49, %38 : vector<2x1x2x128xi1>, vector<2x1x2x128xf32>
    %c4_i32_9 = arith.constant 4 : i32
    %51 = arith.addi %1, %c4_i32_9 : i32
    %52 = arith.index_cast %51 : i32 to index
    %53 = memref.load %arg5[%52] : memref<80xf32, #tpu.memory_space<smem>>
    %54 = vector.broadcast %53 : f32 to vector<2x1x2x128xf32>
    %55 = arith.select %45, %54, %43 : vector<2x1x2x128xi1>, vector<2x1x2x128xf32>
    %cst_10 = arith.constant -5.000000e-01 : f32
    %56 = vector.broadcast %cst_10 : f32 to vector<2x1x2x128xf32>
    %57 = arith.cmpf oge, %0, %56 : vector<2x1x2x128xf32>
    %c5_i32 = arith.constant 5 : i32
    %58 = arith.addi %1, %c5_i32 : i32
    %59 = arith.index_cast %58 : i32 to index
    %60 = memref.load %arg4[%59] : memref<80xf32, #tpu.memory_space<smem>>
    %61 = vector.broadcast %60 : f32 to vector<2x1x2x128xf32>
    %62 = arith.select %57, %61, %50 : vector<2x1x2x128xi1>, vector<2x1x2x128xf32>
    %c5_i32_11 = arith.constant 5 : i32
    %63 = arith.addi %1, %c5_i32_11 : i32
    %64 = arith.index_cast %63 : i32 to index
    %65 = memref.load %arg5[%64] : memref<80xf32, #tpu.memory_space<smem>>
    %66 = vector.broadcast %65 : f32 to vector<2x1x2x128xf32>
    %67 = arith.select %57, %66, %55 : vector<2x1x2x128xi1>, vector<2x1x2x128xf32>
    %cst_12 = arith.constant -4.000000e-01 : f32
    %68 = vector.broadcast %cst_12 : f32 to vector<2x1x2x128xf32>
    %69 = arith.cmpf oge, %0, %68 : vector<2x1x2x128xf32>
    %c6_i32 = arith.constant 6 : i32
    %70 = arith.addi %1, %c6_i32 : i32
    %71 = arith.index_cast %70 : i32 to index
    %72 = memref.load %arg4[%71] : memref<80xf32, #tpu.memory_space<smem>>
    %73 = vector.broadcast %72 : f32 to vector<2x1x2x128xf32>
    %74 = arith.select %69, %73, %62 : vector<2x1x2x128xi1>, vector<2x1x2x128xf32>
    %c6_i32_13 = arith.constant 6 : i32
    %75 = arith.addi %1, %c6_i32_13 : i32
    %76 = arith.index_cast %75 : i32 to index
    %77 = memref.load %arg5[%76] : memref<80xf32, #tpu.memory_space<smem>>
    %78 = vector.broadcast %77 : f32 to vector<2x1x2x128xf32>
    %79 = arith.select %69, %78, %67 : vector<2x1x2x128xi1>, vector<2x1x2x128xf32>
    %cst_14 = arith.constant -3.000000e-01 : f32
    %80 = vector.broadcast %cst_14 : f32 to vector<2x1x2x128xf32>
    %81 = arith.cmpf oge, %0, %80 : vector<2x1x2x128xf32>
    %c7_i32 = arith.constant 7 : i32
    %82 = arith.addi %1, %c7_i32 : i32
    %83 = arith.index_cast %82 : i32 to index
    %84 = memref.load %arg4[%83] : memref<80xf32, #tpu.memory_space<smem>>
    %85 = vector.broadcast %84 : f32 to vector<2x1x2x128xf32>
    %86 = arith.select %81, %85, %74 : vector<2x1x2x128xi1>, vector<2x1x2x128xf32>
    %c7_i32_15 = arith.constant 7 : i32
    %87 = arith.addi %1, %c7_i32_15 : i32
    %88 = arith.index_cast %87 : i32 to index
    %89 = memref.load %arg5[%88] : memref<80xf32, #tpu.memory_space<smem>>
    %90 = vector.broadcast %89 : f32 to vector<2x1x2x128xf32>
    %91 = arith.select %81, %90, %79 : vector<2x1x2x128xi1>, vector<2x1x2x128xf32>
    %cst_16 = arith.constant -2.000000e-01 : f32
    %92 = vector.broadcast %cst_16 : f32 to vector<2x1x2x128xf32>
    %93 = arith.cmpf oge, %0, %92 : vector<2x1x2x128xf32>
    %c8_i32 = arith.constant 8 : i32
    %94 = arith.addi %1, %c8_i32 : i32
    %95 = arith.index_cast %94 : i32 to index
    %96 = memref.load %arg4[%95] : memref<80xf32, #tpu.memory_space<smem>>
    %97 = vector.broadcast %96 : f32 to vector<2x1x2x128xf32>
    %98 = arith.select %93, %97, %86 : vector<2x1x2x128xi1>, vector<2x1x2x128xf32>
    %c8_i32_17 = arith.constant 8 : i32
    %99 = arith.addi %1, %c8_i32_17 : i32
    %100 = arith.index_cast %99 : i32 to index
    %101 = memref.load %arg5[%100] : memref<80xf32, #tpu.memory_space<smem>>
    %102 = vector.broadcast %101 : f32 to vector<2x1x2x128xf32>
    %103 = arith.select %93, %102, %91 : vector<2x1x2x128xi1>, vector<2x1x2x128xf32>
    %cst_18 = arith.constant -1.000000e-01 : f32
    %104 = vector.broadcast %cst_18 : f32 to vector<2x1x2x128xf32>
    %105 = arith.cmpf oge, %0, %104 : vector<2x1x2x128xf32>
    %c9_i32 = arith.constant 9 : i32
    %106 = arith.addi %1, %c9_i32 : i32
    %107 = arith.index_cast %106 : i32 to index
    %108 = memref.load %arg4[%107] : memref<80xf32, #tpu.memory_space<smem>>
    %109 = vector.broadcast %108 : f32 to vector<2x1x2x128xf32>
    %110 = arith.select %105, %109, %98 : vector<2x1x2x128xi1>, vector<2x1x2x128xf32>
    %c9_i32_19 = arith.constant 9 : i32
    %111 = arith.addi %1, %c9_i32_19 : i32
    %112 = arith.index_cast %111 : i32 to index
    %113 = memref.load %arg5[%112] : memref<80xf32, #tpu.memory_space<smem>>
    %114 = vector.broadcast %113 : f32 to vector<2x1x2x128xf32>
    %115 = arith.select %105, %114, %103 : vector<2x1x2x128xi1>, vector<2x1x2x128xf32>
    %cst_20 = arith.constant 0.000000e+00 : f32
    %116 = vector.broadcast %cst_20 : f32 to vector<2x1x2x128xf32>
    %117 = arith.cmpf oge, %0, %116 : vector<2x1x2x128xf32>
    %c10_i32 = arith.constant 10 : i32
    %118 = arith.addi %1, %c10_i32 : i32
    %119 = arith.index_cast %118 : i32 to index
    %120 = memref.load %arg4[%119] : memref<80xf32, #tpu.memory_space<smem>>
    %121 = vector.broadcast %120 : f32 to vector<2x1x2x128xf32>
    %122 = arith.select %117, %121, %110 : vector<2x1x2x128xi1>, vector<2x1x2x128xf32>
    %c10_i32_21 = arith.constant 10 : i32
    %123 = arith.addi %1, %c10_i32_21 : i32
    %124 = arith.index_cast %123 : i32 to index
    %125 = memref.load %arg5[%124] : memref<80xf32, #tpu.memory_space<smem>>
    %126 = vector.broadcast %125 : f32 to vector<2x1x2x128xf32>
    %127 = arith.select %117, %126, %115 : vector<2x1x2x128xi1>, vector<2x1x2x128xf32>
    %cst_22 = arith.constant 1.000000e-01 : f32
    %128 = vector.broadcast %cst_22 : f32 to vector<2x1x2x128xf32>
    %129 = arith.cmpf oge, %0, %128 : vector<2x1x2x128xf32>
    %c11_i32 = arith.constant 11 : i32
    %130 = arith.addi %1, %c11_i32 : i32
    %131 = arith.index_cast %130 : i32 to index
    %132 = memref.load %arg4[%131] : memref<80xf32, #tpu.memory_space<smem>>
    %133 = vector.broadcast %132 : f32 to vector<2x1x2x128xf32>
    %134 = arith.select %129, %133, %122 : vector<2x1x2x128xi1>, vector<2x1x2x128xf32>
    %c11_i32_23 = arith.constant 11 : i32
    %135 = arith.addi %1, %c11_i32_23 : i32
    %136 = arith.index_cast %135 : i32 to index
    %137 = memref.load %arg5[%136] : memref<80xf32, #tpu.memory_space<smem>>
    %138 = vector.broadcast %137 : f32 to vector<2x1x2x128xf32>
    %139 = arith.select %129, %138, %127 : vector<2x1x2x128xi1>, vector<2x1x2x128xf32>
    %cst_24 = arith.constant 2.000000e-01 : f32
    %140 = vector.broadcast %cst_24 : f32 to vector<2x1x2x128xf32>
    %141 = arith.cmpf oge, %0, %140 : vector<2x1x2x128xf32>
    %c12_i32 = arith.constant 12 : i32
    %142 = arith.addi %1, %c12_i32 : i32
    %143 = arith.index_cast %142 : i32 to index
    %144 = memref.load %arg4[%143] : memref<80xf32, #tpu.memory_space<smem>>
    %145 = vector.broadcast %144 : f32 to vector<2x1x2x128xf32>
    %146 = arith.select %141, %145, %134 : vector<2x1x2x128xi1>, vector<2x1x2x128xf32>
    %c12_i32_25 = arith.constant 12 : i32
    %147 = arith.addi %1, %c12_i32_25 : i32
    %148 = arith.index_cast %147 : i32 to index
    %149 = memref.load %arg5[%148] : memref<80xf32, #tpu.memory_space<smem>>
    %150 = vector.broadcast %149 : f32 to vector<2x1x2x128xf32>
    %151 = arith.select %141, %150, %139 : vector<2x1x2x128xi1>, vector<2x1x2x128xf32>
    %cst_26 = arith.constant 3.000000e-01 : f32
    %152 = vector.broadcast %cst_26 : f32 to vector<2x1x2x128xf32>
    %153 = arith.cmpf oge, %0, %152 : vector<2x1x2x128xf32>
    %c13_i32 = arith.constant 13 : i32
    %154 = arith.addi %1, %c13_i32 : i32
    %155 = arith.index_cast %154 : i32 to index
    %156 = memref.load %arg4[%155] : memref<80xf32, #tpu.memory_space<smem>>
    %157 = vector.broadcast %156 : f32 to vector<2x1x2x128xf32>
    %158 = arith.select %153, %157, %146 : vector<2x1x2x128xi1>, vector<2x1x2x128xf32>
    %c13_i32_27 = arith.constant 13 : i32
    %159 = arith.addi %1, %c13_i32_27 : i32
    %160 = arith.index_cast %159 : i32 to index
    %161 = memref.load %arg5[%160] : memref<80xf32, #tpu.memory_space<smem>>
    %162 = vector.broadcast %161 : f32 to vector<2x1x2x128xf32>
    %163 = arith.select %153, %162, %151 : vector<2x1x2x128xi1>, vector<2x1x2x128xf32>
    %cst_28 = arith.constant 4.000000e-01 : f32
    %164 = vector.broadcast %cst_28 : f32 to vector<2x1x2x128xf32>
    %165 = arith.cmpf oge, %0, %164 : vector<2x1x2x128xf32>
    %c14_i32 = arith.constant 14 : i32
    %166 = arith.addi %1, %c14_i32 : i32
    %167 = arith.index_cast %166 : i32 to index
    %168 = memref.load %arg4[%167] : memref<80xf32, #tpu.memory_space<smem>>
    %169 = vector.broadcast %168 : f32 to vector<2x1x2x128xf32>
    %170 = arith.select %165, %169, %158 : vector<2x1x2x128xi1>, vector<2x1x2x128xf32>
    %c14_i32_29 = arith.constant 14 : i32
    %171 = arith.addi %1, %c14_i32_29 : i32
    %172 = arith.index_cast %171 : i32 to index
    %173 = memref.load %arg5[%172] : memref<80xf32, #tpu.memory_space<smem>>
    %174 = vector.broadcast %173 : f32 to vector<2x1x2x128xf32>
    %175 = arith.select %165, %174, %163 : vector<2x1x2x128xi1>, vector<2x1x2x128xf32>
    %cst_30 = arith.constant 5.000000e-01 : f32
    %176 = vector.broadcast %cst_30 : f32 to vector<2x1x2x128xf32>
    %177 = arith.cmpf oge, %0, %176 : vector<2x1x2x128xf32>
    %c15_i32 = arith.constant 15 : i32
    %178 = arith.addi %1, %c15_i32 : i32
    %179 = arith.index_cast %178 : i32 to index
    %180 = memref.load %arg4[%179] : memref<80xf32, #tpu.memory_space<smem>>
    %181 = vector.broadcast %180 : f32 to vector<2x1x2x128xf32>
    %182 = arith.select %177, %181, %170 : vector<2x1x2x128xi1>, vector<2x1x2x128xf32>
    %c15_i32_31 = arith.constant 15 : i32
    %183 = arith.addi %1, %c15_i32_31 : i32
    %184 = arith.index_cast %183 : i32 to index
    %185 = memref.load %arg5[%184] : memref<80xf32, #tpu.memory_space<smem>>
    %186 = vector.broadcast %185 : f32 to vector<2x1x2x128xf32>
    %187 = arith.select %177, %186, %175 : vector<2x1x2x128xi1>, vector<2x1x2x128xf32>
    %cst_32 = arith.constant 6.000000e-01 : f32
    %188 = vector.broadcast %cst_32 : f32 to vector<2x1x2x128xf32>
    %189 = arith.cmpf oge, %0, %188 : vector<2x1x2x128xf32>
    %c16_i32 = arith.constant 16 : i32
    %190 = arith.addi %1, %c16_i32 : i32
    %191 = arith.index_cast %190 : i32 to index
    %192 = memref.load %arg4[%191] : memref<80xf32, #tpu.memory_space<smem>>
    %193 = vector.broadcast %192 : f32 to vector<2x1x2x128xf32>
    %194 = arith.select %189, %193, %182 : vector<2x1x2x128xi1>, vector<2x1x2x128xf32>
    %c16_i32_33 = arith.constant 16 : i32
    %195 = arith.addi %1, %c16_i32_33 : i32
    %196 = arith.index_cast %195 : i32 to index
    %197 = memref.load %arg5[%196] : memref<80xf32, #tpu.memory_space<smem>>
    %198 = vector.broadcast %197 : f32 to vector<2x1x2x128xf32>
    %199 = arith.select %189, %198, %187 : vector<2x1x2x128xi1>, vector<2x1x2x128xf32>
    %cst_34 = arith.constant 0.699999988 : f32
    %200 = vector.broadcast %cst_34 : f32 to vector<2x1x2x128xf32>
    %201 = arith.cmpf oge, %0, %200 : vector<2x1x2x128xf32>
    %c17_i32 = arith.constant 17 : i32
    %202 = arith.addi %1, %c17_i32 : i32
    %203 = arith.index_cast %202 : i32 to index
    %204 = memref.load %arg4[%203] : memref<80xf32, #tpu.memory_space<smem>>
    %205 = vector.broadcast %204 : f32 to vector<2x1x2x128xf32>
    %206 = arith.select %201, %205, %194 : vector<2x1x2x128xi1>, vector<2x1x2x128xf32>
    %c17_i32_35 = arith.constant 17 : i32
    %207 = arith.addi %1, %c17_i32_35 : i32
    %208 = arith.index_cast %207 : i32 to index
    %209 = memref.load %arg5[%208] : memref<80xf32, #tpu.memory_space<smem>>
    %210 = vector.broadcast %209 : f32 to vector<2x1x2x128xf32>
    %211 = arith.select %201, %210, %199 : vector<2x1x2x128xi1>, vector<2x1x2x128xf32>
    %cst_36 = arith.constant 8.000000e-01 : f32
    %212 = vector.broadcast %cst_36 : f32 to vector<2x1x2x128xf32>
    %213 = arith.cmpf oge, %0, %212 : vector<2x1x2x128xf32>
    %c18_i32 = arith.constant 18 : i32
    %214 = arith.addi %1, %c18_i32 : i32
    %215 = arith.index_cast %214 : i32 to index
    %216 = memref.load %arg4[%215] : memref<80xf32, #tpu.memory_space<smem>>
    %217 = vector.broadcast %216 : f32 to vector<2x1x2x128xf32>
    %218 = arith.select %213, %217, %206 : vector<2x1x2x128xi1>, vector<2x1x2x128xf32>
    %c18_i32_37 = arith.constant 18 : i32
    %219 = arith.addi %1, %c18_i32_37 : i32
    %220 = arith.index_cast %219 : i32 to index
    %221 = memref.load %arg5[%220] : memref<80xf32, #tpu.memory_space<smem>>
    %222 = vector.broadcast %221 : f32 to vector<2x1x2x128xf32>
    %223 = arith.select %213, %222, %211 : vector<2x1x2x128xi1>, vector<2x1x2x128xf32>
    %cst_38 = arith.constant 0.899999976 : f32
    %224 = vector.broadcast %cst_38 : f32 to vector<2x1x2x128xf32>
    %225 = arith.cmpf oge, %0, %224 : vector<2x1x2x128xf32>
    %c19_i32 = arith.constant 19 : i32
    %226 = arith.addi %1, %c19_i32 : i32
    %227 = arith.index_cast %226 : i32 to index
    %228 = memref.load %arg4[%227] : memref<80xf32, #tpu.memory_space<smem>>
    %229 = vector.broadcast %228 : f32 to vector<2x1x2x128xf32>
    %230 = arith.select %225, %229, %218 : vector<2x1x2x128xi1>, vector<2x1x2x128xf32>
    %c19_i32_39 = arith.constant 19 : i32
    %231 = arith.addi %1, %c19_i32_39 : i32
    %232 = arith.index_cast %231 : i32 to index
    %233 = memref.load %arg5[%232] : memref<80xf32, #tpu.memory_space<smem>>
    %234 = vector.broadcast %233 : f32 to vector<2x1x2x128xf32>
    %235 = arith.select %225, %234, %223 : vector<2x1x2x128xi1>, vector<2x1x2x128xf32>
    %236 = arith.mulf %0, %230 : vector<2x1x2x128xf32>
    %237 = arith.addf %236, %235 : vector<2x1x2x128xf32>
    %c0_40 = arith.constant 0 : index
    %c0_41 = arith.constant 0 : index
    %c0_42 = arith.constant 0 : index
    %c0_43 = arith.constant 0 : index
    %238 = vector.load %arg6[%c0_40, %c0_41, %c0_42, %c0_43] : memref<2x1x2x128xf32, #tpu.memory_space<vmem>>, vector<2x1x2x128xf32>
    tpu.vector_store %arg6[%c0_40, %c0_41, %c0_42, %c0_43], %237 {strides = array<i32>} : memref<2x1x2x128xf32, #tpu.memory_space<vmem>>, vector<2x1x2x128xf32>,
    return
  }
  func.func @transform_0(%arg0: i32, %arg1: i32, %arg2: i32) -> (i32, i32, i32, i32) {
    %c0_i32 = arith.constant 0 : i32
    %c0_i32_0 = arith.constant 0 : i32
    return %arg0, %arg1, %arg2, %c0_i32 : i32, i32, i32, i32
  }
  func.func @transform_1(%arg0: i32, %arg1: i32, %arg2: i32) -> i32 {
    %c0_i32 = arith.constant 0 : i32
    %c0_i32_0 = arith.constant 0 : i32
    return %c0_i32 : i32
  }
  func.func @transform_2(%arg0: i32, %arg1: i32, %arg2: i32) -> i32 {
    %c0_i32 = arith.constant 0 : i32
    %c0_i32_0 = arith.constant 0 : i32
    return %c0_i32 : i32
  }
  func.func @transform_3(%arg0: i32, %arg1: i32, %arg2: i32) -> (i32, i32, i32, i32) {
    %c0_i32 = arith.constant 0 : i32
    %c0_i32_0 = arith.constant 0 : i32
    return %arg0, %arg1, %arg2, %c0_i32 : i32, i32, i32, i32
  }
}

</mosaic_0001>

<bundles_post_ra>
// kernel: tpu_custom_call.1
= control target key start
LH: loop header
LB: loop body
LE: loop exit
PB: predicated region body
PF: predicated region fallthrough
CT: control target
= control target key end

     0   :  { %8 = vsyncpa [#allocation3], 0  ;;  %s1379_s0 = inlined_call_operand.hbm [shape: f32[2,4,2,128], index: 0, kind: input, shape index: {}]   ;;  %s1380_s1 = inlined_call_operand.vmem [shape: f32[80], index: 1, kind: input, shape index: {}]   ;;  %s1381_s2 = inlined_call_operand.vmem [shape: f32[80], index: 2, kind: input, shape index: {}]   ;;  %s1382_s3 = inlined_call_operand.hbm [shape: f32[2,4,2,128], index: 3, kind: output, shape index: {}]  }
   0x1   :  { %10 = vsyncpa [#allocation3 + $0x1], 0 }
   0x2   :  { %11 = vsyncpa [#allocation5], 0 }
   0x3   :  { %12 = vsyncpa [#allocation8], 0 }
   0x4   :  { %13 = vsyncpa [#allocation4], 0 }
   0x5   :  { %15 = vsyncpa [#allocation4 + $0x1], 0  ;;  %s883_s12 = smov 0   ;;  %s885_s13 = smov 0  }
   0x6   :  { %s887_s14 = smov 0   ;;  %s889_s15 = smov 0  }
   0x7   :  { %s891_s16 = smov 0   ;;  %s893_s17 = smov 0  }
   0x8 LB: > { %s599_s18 = sadd.s32 4294967295, %s851_s17   ;;  %s600_s19 = sadd.s32 4294967294, %s851_s17   ;;  %s851_s17 = sphi %s893_s17, %s21_s17   ;;  %s847_s16 = sphi %s891_s16, %s1407_s16   ;;  %s843_s15 = sphi %s889_s15, %s1406_s15   ;;  %s839_s14 = sphi %s887_s14, %s1405_s14   ;;  %s835_s13 = sphi %s885_s13, %s1404_s13   ;;  %s831_s12 = sphi %s883_s12, %s1403_s12  }
   0x9   : > { %s51_s20 = sadd.s32 1, %s839_s14  ;;  %p58_p0 = scmp.ne.s32.totalorder %s839_s14, %s835_s13 }
   0xa   : > { %p59_p1 = scmp.eq.s32.totalorder %s851_s17, 0  ;;  %p64_p2 = scmp.ne.s32.totalorder %s835_s13, %s831_s12 }
   0xb   : > { %p921_p3 = scmp.eq.s32.totalorder %s599_s18, 0  ;;  %p134_p4 = scmp.eq.s32.totalorder %s599_s18, 3 }
   0xc   : > { %p925_p5 = por %p59_p1, %p58_p0  ;;  %p140_p6 = scmp.eq.s32.totalorder %s600_s19, 3 }
   0xd   : > { %s1389_s21 = scalar_select %p921_p3, 1, 0 }
   0xe   : > { %p931_p7 = por %p921_p3, %p64_p2  ;;  %p935_p8 = por %p134_p4, %p58_p0 }
   0xf   : > { %p939_p9 = por %p140_p6, %p64_p2  ;;  %p601_p10 = scmp.ge.s32.totalorder %s851_s17, 1 }
  0x10   : > { %s1391_s23 = scalar_select %p931_p7, 1, 0 }
  0x11   : > { %s1392_s24 = scalar_select %p935_p8, 1, 0 }
  0x12   : > { %s1393_s25 = scalar_select %p939_p9, 1, 0 }
  0x13   : > { %p147_p11 = scmp.lt.s32.totalorder %s851_s17, 5  ;;  %s160_s28 = sshll.u32 %s1380_s1, 4  ;;  %s161_s28 = int_to_ptr.vmem [resolvable:$true] %s160_s28 }
  0x14   : > { %p645_p13 = scmp.lt.s32.totalorder %s851_s17, 4  ;;  %s171_s5 = sshll.u32 %s1381_s2, 4  ;;  %s172_s5 = int_to_ptr.vmem [resolvable:$true] %s171_s5 }
  0x15   : > { %p948_p12 = pnand %p601_p10, %p147_p11  ;;  %s705_s8 = scalar_lea.vmem %s161_s28, 16 }
  0x16   : > { %p960_p1 = pnand %p645_p13, %p925_p5  ;;  %p706_p4 = scmp.ne.s32.totalorder %s161_s28, %s705_s8 }
  0x17   : > { %s1394_s29 = scalar_select %p948_p12, 1, 0 }
  0x18   : > { %p628_p0 = pneg %p948_p12  ;;  %p713_p9 = scmp.lt.s32.totalorder %s161_s28, %s161_s28 }
  0x19   : > { %s1395_s6 = scalar_select %p960_p1, 1, 0 }
  0x1a   : > { %p966_p2 = pnand %p628_p0, %p921_p3  ;;  %p714_p8 = scmp.lt.s32.totalorder %s705_s8, %s705_s8 }
  0x1c   : > { %p707_p6 = pneg %p966_p2  ;;  %p715_p7 = por %p714_p8, %p713_p9 }
  0x1e   : > { %p708_p10 = pnand %p707_p6, %p706_p4 }
  0x20   : > { %p709_p11 = pneg %p708_p10 }
  0x22   : > { %p716_p5 = pnand %p715_p7, %p709_p11 }
  0x24   : > { %719 = shalt.err (!%p716_p5)
}
  0x25   : > { %s853_s9 = smov [#allocation6]   ;;  %s720_s10 = scalar_lea.vmem %s172_s5, 16 }
  0x26   : > { %631 = dma.vmem_to_smem (!%p966_p2), %s161_s28, 16, %s853_s9, [#allocation5]  }
  0x27   : > { %p721_p13 = scmp.ne.s32.totalorder %s172_s5, %s720_s10  ;;  %p728_p12 = scmp.lt.s32.totalorder %s172_s5, %s172_s5 }
  0x28   : > { %p729_p1 = scmp.lt.s32.totalorder %s720_s10, %s720_s10 }
  0x29   : > { %p723_p0 = pnand %p721_p13, %p707_p6 }
  0x2a   : > { %p730_p4 = por %p729_p1, %p728_p12 }
  0x2b   : > { %p724_p3 = pneg %p723_p0 }
  0x2d   : > { %p731_p10 = pnand %p730_p4, %p724_p3 }
  0x2f   : > { %734 = shalt.err (!%p731_p10)
}
  0x30   : > { %s854_s11 = smov [#allocation7]   ;;  %s36_s18 = sadd.s32 1, %s847_s16 }
  0x31   : > { %634 = dma.vmem_to_smem (!%p966_p2), %s172_s5, 16, %s854_s11, [#allocation8]  }
  0x32   : > { %s182_s19 = sand.u32 1, %s839_s14   ;;  %p38_p7 = scmp.ge.s32.totalorder %s36_s18, 4 }
  0x33   : > { %s605_s22 = sshll.u32 %s182_s19, 2  ;;  %s606_s26 = sshll.u32 %s847_s16, 5 }
  0x34   : > { %s1409_s18 = smov (%p38_p7, %s36_s18), 0  ;;  %s984_s30 = scalar_lea.hbm %s1379_s0, %s606_s26 }
  0x35   : > { %s45_s4 = ssub.s32 %s847_s16, %s1409_s18  ;;  %s186_s7 = scalar_lea.vmem [#allocation2], %s605_s22 }
  0x36   : > { %s196_s8 = sshll.u32 %s186_s7, 4  ;;  %p49_p3 = scmp.eq.s32.totalorder %s45_s4, 0  ;;  %s197_s8 = int_to_ptr.vmem [resolvable:$true] %s196_s8 }
  0x37   : > { %s183_s9 = scalar_lea.sflag [#allocation3], %s182_s19  ;;  %p1397_p8 = scmp.ne.s32.totalorder %s1395_s6, 0 }
  0x38   : > { %s991_s5 = scalar_select %p49_p3, %s839_s14, %s51_s20  }
  0x39   : > { %p737_p9 = pneg %p1397_p8  ;;  %s748_s10 = scalar_lea.vmem %s197_s8, 64 }
  0x3a   : > { %p749_p12 = scmp.ne.s32.totalorder %s197_s8, %s748_s10  ;;  %s855_s11 = smov [#allocation2]  }
  0x3b   : > { %s753_s27 = sshll.u32 %s855_s11, 4  ;;  %s754_s27 = int_to_ptr.vmem [resolvable:$false] %s753_s27 }
  0x3c   : > { %p751_p1 = pnand %p749_p12, %p737_p9  ;;  %s755_s26 = scalar_lea.vmem %s754_s27, 128 }
  0x3d   : > { %p756_p6 = scmp.lt.s32.totalorder %s197_s8, %s754_s27  ;;  %p757_p11 = scmp.lt.s32.totalorder %s755_s26, %s748_s10 }
  0x3e   : > { %p752_p2 = pneg %p751_p1 }
  0x3f   : > { %p758_p5 = por %p757_p11, %p756_p6 }
  0x41   : > { %p759_p13 = pnand %p758_p5, %p752_p2 }
  0x43   : > { %762 = shalt.err (!%p759_p13)
}
  0x44   : > { %s856_s22 = smov 128   ;;  %s857_s20 = smov 32  }
  0x45   : > { %s858_s19 = smov 2   ;;  %p1398_p0 = scmp.ne.s32.totalorder %s1394_s29, 0 }
  0x46   : > { %638 = dma.hbm_to_vmem [thread:$0]  (!%p1397_p8), %s984_s30, 64, %s197_s8, %s183_s9, %s856_s22, %s857_s20, %s858_s19  }
  0x47   : > { %208 = sbr.rel (%p1398_p0) target bundleno = 151 (0x97), region = 32  ;;  %s1001_s28 = sand.u32 (!%p1398_p0), 1, %s835_s13  }
  0x48   : > { %s608_s4 = sshll.u32 (!%p1398_p0), %s1001_s28, 2  ;;  %s211_s7 = scalar_lea.sflag (!%p1398_p0), [#allocation3], %s1001_s28 }
  0x49   : > { %s214_s10 = scalar_lea.vmem (!%p1398_p0), [#allocation2], %s608_s4  ;;  %p1399_p4 = scmp.ne.s32.totalorder (!%p1398_p0), %s1391_s23, 0 }
  0x4c   : > { %814 = dma.done.wait (%p1399_p4), %s211_s7, 64  }
  0x4d   : > { %816 = vsyncadd (%p1399_p4), %s211_s7, 4294967232  ;;  %p1400_p10 = scmp.ne.s32.totalorder %s1389_s21, 0 }
  0x4f   : > { %818 = dma.done.wait (%p1400_p10), [#allocation5], 16  }
  0x50   : > { %820 = vsyncadd (%p1400_p10), [#allocation5], 4294967280 }
  0x51   : > { %822 = dma.done.wait (%p1400_p10), [#allocation8], 16  }
  0x52   : > { %824 = vsyncadd (%p1400_p10), [#allocation8], 4294967280 }
  0x53   : > { %227 = sfence }
  0x54   : > { %s1020_s29 = smul.u32 20, %s843_s15  ;;  %v1026_v0 = vld [vmem:[%s214_s10] sm:$0x3]  ;;  %v1028_v1 = vld [vmem:[%s214_s10 + $0x2] sm:$0x3]  ;;  %p1401_p3 = scmp.ne.s32.totalorder %s1392_s24, 0 }
  0x55   : > { %vm255_vm0 = vcmp.ge.f32.partialorder %v1026_v0, -0.9  ;;  %vm256_vm1 = vcmp.ge.f32.partialorder %v1028_v1, -0.9  ;;  %vm266_vm2 = vcmp.ge.f32.partialorder %v1026_v0, -0.8 }
  0x56   : > { %s251_s23 = sld [smem:[#allocation6 + %s1020_s29]]  ;;  %s257_s6 = sadd.s32 1, %s1020_s29  ;;  %vm267_vm3 = vcmp.ge.f32.partialorder %v1028_v1, -0.8  ;;  %vm277_vm4 = vcmp.ge.f32.partialorder %v1026_v0, -0.7 }
  0x57   : > { %s253_s30 = sld [smem:[#allocation7 + %s1020_s29]]  ;;  %s268_s8 = sadd.s32 2, %s1020_s29  ;;  %vm278_vm5 = vcmp.ge.f32.partialorder %v1028_v1, -0.7  ;;  %vm288_vm6 = vcmp.ge.f32.partialorder %v1026_v0, -0.6 }
  0x58   : > { %s258_s9 = sld [smem:[#allocation6 + %s257_s6]]  ;;  %s279_s11 = sadd.s32 3, %s1020_s29  ;;  %vm289_vm7 = vcmp.ge.f32.partialorder %v1028_v1, -0.6  ;;  %vm299_vm8 = vcmp.ge.f32.partialorder %v1026_v0, -0.5  ;;  %vm300_vm9 = vcmp.ge.f32.partialorder %v1028_v1, -0.5 }
  0x59   : > { %s262_s21 = sld [smem:[#allocation7 + %s257_s6]]  ;;  %s290_s22 = sadd.s32 4, %s1020_s29  ;;  %vm310_vm10 = vcmp.ge.f32.partialorder %v1026_v0, -0.4  ;;  %vm311_vm11 = vcmp.ge.f32.partialorder %v1028_v1, -0.4 }
  0x5a   : > { %s269_s27 = sld [smem:[#allocation6 + %s268_s8]]  ;;  %s301_s7 = sadd.s32 5, %s1020_s29  ;;  %vm321_vm12 = vcmp.ge.f32.partialorder %v1026_v0, -0.3  ;;  %vm322_vm13 = vcmp.ge.f32.partialorder %v1028_v1, -0.3 }
  0x5b   : > { %s1031_s26 = sld [smem:[#allocation7 + %s268_s8]]  ;;  %s312_s6 = sadd.s32 6, %s1020_s29  ;;  %vm332_vm14 = vcmp.ge.f32.partialorder %v1026_v0, -0.2  ;;  %vm333_vm15 = vcmp.ge.f32.partialorder %v1028_v1, -0.2 }
  0x5c   : > { %v252_v2 = vstv %s251_s23  ;;  %s1036_s20 = sld [smem:[#allocation6 + %s279_s11]] }
  0x5d   : > { %v254_v3 = vstv %s253_s30  ;;  %s1038_s19 = sld [smem:[#allocation7 + %s279_s11]] }
  0x5e   : > { %v259_v4 = vstv %s258_s9  ;;  %s1043_s10 = sld [smem:[#allocation6 + %s290_s22]]  ;;  %s323_s9 = sadd.s32 7, %s1020_s29 }
  0x5f   : > { %v260_v5 = vsel %vm255_vm0, %v259_v4, %v252_v2  ;;  %v261_v6 = vsel %vm256_vm1, %v259_v4, %v252_v2  ;;  %v263_v7 = vstv %s262_s21  ;;  %s1050_s23 = sld [smem:[#allocation7 + %s290_s22]] }
  0x60   : > { %v264_v8 = vsel %vm255_vm0, %v263_v7, %v254_v3  ;;  %v265_v9 = vsel %vm256_vm1, %v263_v7, %v254_v3  ;;  %v270_v10 = vstv %s269_s27  ;;  %s1058_s30 = sld [smem:[#allocation6 + %s301_s7]]  ;;  %s334_s27 = sadd.s32 8, %s1020_s29  ;;  %vm343_vm0 = vcmp.ge.f32.partialorder %v1026_v0, -0.1 }
  0x61   : > { %v271_v11 = vsel %vm266_vm2, %v270_v10, %v260_v5  ;;  %v272_v12 = vsel %vm267_vm3, %v270_v10, %v261_v6  ;;  %v274_v13 = vstv %s1031_s26  ;;  %s1066_s8 = sld [smem:[#allocation7 + %s301_s7]]  ;;  %vm344_vm1 = vcmp.ge.f32.partialorder %v1028_v1, -0.1 }
  0x62   : > { %v275_v14 = vsel %vm266_vm2, %v274_v13, %v264_v8  ;;  %v276_v15 = vsel %vm267_vm3, %v274_v13, %v265_v9  ;;  %v281_v16 = vstv %s1036_s20  ;;  %s1075_s21 = sld [smem:[#allocation6 + %s312_s6]]  ;;  %s345_s20 = sadd.s32 9, %s1020_s29  ;;  %vm354_vm2 = vcmp.ge.f32.partialorder %v1026_v0, 0.0 }
  0x63   : > { %v282_v17 = vsel %vm277_vm4, %v281_v16, %v271_v11  ;;  %v283_v18 = vsel %vm278_vm5, %v281_v16, %v272_v12  ;;  %v285_v19 = vstv %s1038_s19  ;;  %s1083_s11 = sld [smem:[#allocation7 + %s312_s6]]  ;;  %vm355_vm3 = vcmp.ge.f32.partialorder %v1028_v1, 0.0 }
  0x64   : > { %v286_v20 = vsel %vm277_vm4, %v285_v19, %v275_v14  ;;  %v287_v21 = vsel %vm278_vm5, %v285_v19, %v276_v15  ;;  %v292_v22 = vstv %s1043_s10  ;;  %s1092_s26 = sld [smem:[#allocation6 + %s323_s9]]  ;;  %s356_s10 = sadd.s32 10, %s1020_s29  ;;  %vm365_vm4 = vcmp.ge.f32.partialorder %v1026_v0, 0.1 }
  0x65   : > { %v293_v23 = vsel %vm288_vm6, %v292_v22, %v282_v17  ;;  %v294_v24 = vsel %vm289_vm7, %v292_v22, %v283_v18  ;;  %v296_v25 = vstv %s1050_s23  ;;  %s1100_s22 = sld [smem:[#allocation7 + %s323_s9]]  ;;  %vm366_vm5 = vcmp.ge.f32.partialorder %v1028_v1, 0.1 }
  0x66   : > { %v297_v26 = vsel %vm288_vm6, %v296_v25, %v286_v20  ;;  %v298_v27 = vsel %vm289_vm7, %v296_v25, %v287_v21  ;;  %v303_v28 = vstv %s1058_s30  ;;  %s1109_s19 = sld [smem:[#allocation6 + %s334_s27]]  ;;  %s367_s30 = sadd.s32 11, %s1020_s29  ;;  %vm376_vm6 = vcmp.ge.f32.partialorder %v1026_v0, 0.2 }
  0x67   : > { %v304_v29 = vsel %vm299_vm8, %v303_v28, %v293_v23  ;;  %v305_v30 = vsel %vm300_vm9, %v303_v28, %v294_v24  ;;  %v307_v31 = vstv %s1066_s8  ;;  %s1117_s7 = sld [smem:[#allocation7 + %s334_s27]]  ;;  %vm377_vm7 = vcmp.ge.f32.partialorder %v1028_v1, 0.2 }
  0x68   : > { %v308_v32 = vsel %vm299_vm8, %v307_v31, %v297_v26  ;;  %v309_v33 = vsel %vm300_vm9, %v307_v31, %v298_v27  ;;  %v314_v34 = vstv %s1075_s21  ;;  %s1126_s23 = sld [smem:[#allocation6 + %s345_s20]]  ;;  %s378_s21 = sadd.s32 12, %s1020_s29  ;;  %vm387_vm8 = vcmp.ge.f32.partialorder %v1026_v0, 0.3 }
  0x69   : > { %v315_v35 = vsel %vm310_vm10, %v314_v34, %v304_v29  ;;  %v316_v36 = vsel %vm311_vm11, %v314_v34, %v305_v30  ;;  %v318_v37 = vstv %s1083_s11  ;;  %s1134_s6 = sld [smem:[#allocation7 + %s345_s20]]  ;;  %vm388_vm9 = vcmp.ge.f32.partialorder %v1028_v1, 0.3 }
  0x6a   : > { %v319_v38 = vsel %vm310_vm10, %v318_v37, %v308_v32  ;;  %v320_v39 = vsel %vm311_vm11, %v318_v37, %v309_v33  ;;  %v325_v40 = vstv %s1092_s26  ;;  %s1143_s8 = sld [smem:[#allocation6 + %s356_s10]]  ;;  %s389_s26 = sadd.s32 13, %s1020_s29  ;;  %vm398_vm10 = vcmp.ge.f32.partialorder %v1026_v0, 0.4 }
  0x6b   : > { %v326_v41 = vsel %vm321_vm12, %v325_v40, %v315_v35  ;;  %v327_v42 = vsel %vm322_vm13, %v325_v40, %v316_v36  ;;  %v329_v43 = vstv %s1100_s22  ;;  %s1151_s9 = sld [smem:[#allocation7 + %s356_s10]]  ;;  %vm399_vm11 = vcmp.ge.f32.partialorder %v1028_v1, 0.4 }
  0x6c   : > { %v330_v44 = vsel %vm321_vm12, %v329_v43, %v319_v38  ;;  %v331_v45 = vsel %vm322_vm13, %v329_v43, %v320_v39  ;;  %v336_v46 = vstv %s1109_s19  ;;  %s1160_s11 = sld [smem:[#allocation6 + %s367_s30]]  ;;  %s400_s19 = sadd.s32 14, %s1020_s29  ;;  %vm409_vm12 = vcmp.ge.f32.partialorder %v1026_v0, 0.5 }
  0x6d   : > { %v337_v47 = vsel %vm332_vm14, %v336_v46, %v326_v41  ;;  %v338_v48 = vsel %vm333_vm15, %v336_v46, %v327_v42  ;;  %v340_v49 = vstv %s1117_s7  ;;  %s1168_s27 = sld [smem:[#allocation7 + %s367_s30]]  ;;  %vm410_vm13 = vcmp.ge.f32.partialorder %v1028_v1, 0.5 }
  0x6e   : > { %v341_v50 = vsel %vm332_vm14, %v340_v49, %v330_v44  ;;  %v342_v51 = vsel %vm333_vm15, %v340_v49, %v331_v45  ;;  %v347_v52 = vstv %s1126_s23  ;;  %s1177_s22 = sld [smem:[#allocation6 + %s378_s21]]  ;;  %s411_s23 = sadd.s32 15, %s1020_s29  ;;  %vm420_vm14 = vcmp.ge.f32.partialorder %v1026_v0, 0.6 }
  0x6f   : > { %v348_v53 = vsel %vm343_vm0, %v347_v52, %v337_v47  ;;  %v349_v54 = vsel %vm344_vm1, %v347_v52, %v338_v48  ;;  %v351_v55 = vstv %s1134_s6  ;;  %s1185_s20 = sld [smem:[#allocation7 + %s378_s21]]  ;;  %vm421_vm15 = vcmp.ge.f32.partialorder %v1028_v1, 0.6 }
  0x70   : > { %v352_v56 = vsel %vm343_vm0, %v351_v55, %v341_v50  ;;  %v353_v57 = vsel %vm344_vm1, %v351_v55, %v342_v51  ;;  %v358_v58 = vstv %s1143_s8  ;;  %s1194_s7 = sld [smem:[#allocation6 + %s389_s26]]  ;;  %s422_s8 = sadd.s32 16, %s1020_s29  ;;  %vm431_vm0 = vcmp.ge.f32.partialorder %v1026_v0, 0.7 }
  0x71   : > { %v359_v59 = vsel %vm354_vm2, %v358_v58, %v348_v53  ;;  %v360_v60 = vsel %vm355_vm3, %v358_v58, %v349_v54  ;;  %v362_v61 = vstv %s1151_s9  ;;  %s1202_s10 = sld [smem:[#allocation7 + %s389_s26]]  ;;  %vm432_vm1 = vcmp.ge.f32.partialorder %v1028_v1, 0.7 }
  0x72   : > { %v363_v62 = vsel %vm354_vm2, %v362_v61, %v352_v56  ;;  %v364_v63 = vsel %vm355_vm3, %v362_v61, %v353_v57  ;;  %v369_v2 = vstv %s1160_s11  ;;  %s1211_s6 = sld [smem:[#allocation6 + %s400_s19]]  ;;  %s433_s11 = sadd.s32 17, %s1020_s29  ;;  %vm442_vm2 = vcmp.ge.f32.partialorder %v1026_v0, 0.8 }
  0x73   : > { %v370_v3 = vsel %vm365_vm4, %v369_v2, %v359_v59  ;;  %v371_v4 = vsel %vm366_vm5, %v369_v2, %v360_v60  ;;  %v373_v5 = vstv %s1168_s27  ;;  %s1219_s30 = sld [smem:[#allocation7 + %s400_s19]]  ;;  %vm443_vm3 = vcmp.ge.f32.partialorder %v1028_v1, 0.8 }
  0x74   : > { %v374_v6 = vsel %vm365_vm4, %v373_v5, %v363_v62  ;;  %v375_v7 = vsel %vm366_vm5, %v373_v5, %v364_v63  ;;  %v380_v8 = vstv %s1177_s22  ;;  %s1228_s9 = sld [smem:[#allocation6 + %s411_s23]]  ;;  %s444_s22 = sadd.s32 18, %s1020_s29  ;;  %vm453_vm4 = vcmp.ge.f32.partialorder %v1026_v0, 0.9 }
  0x75   : > { %v381_v9 = vsel %vm376_vm6, %v380_v8, %v370_v3  ;;  %v382_v10 = vsel %vm377_vm7, %v380_v8, %v371_v4  ;;  %v384_v11 = vstv %s1185_s20  ;;  %s1236_s21 = sld [smem:[#allocation7 + %s411_s23]]  ;;  %vm454_vm5 = vcmp.ge.f32.partialorder %v1028_v1, 0.9 }
  0x76   : > { %v385_v12 = vsel %vm376_vm6, %v384_v11, %v374_v6  ;;  %v386_v13 = vsel %vm377_vm7, %v384_v11, %v375_v7  ;;  %v391_v14 = vstv %s1194_s7  ;;  %s1245_s27 = sld [smem:[#allocation6 + %s422_s8]]  ;;  %s455_s7 = sadd.s32 19, %s1020_s29 }
  0x77   : > { %v392_v15 = vsel %vm387_vm8, %v391_v14, %v381_v9  ;;  %v393_v16 = vsel %vm388_vm9, %v391_v14, %v382_v10  ;;  %v395_v17 = vstv %s1202_s10  ;;  %s1253_s26 = sld [smem:[#allocation7 + %s422_s8]]  ;;  %s245_s8 = scalar_lea.vmem [#allocation9], %s608_s4 }
  0x78   : > { %v396_v18 = vsel %vm387_vm8, %v395_v17, %v385_v12  ;;  %v397_v19 = vsel %vm388_vm9, %v395_v17, %v386_v13  ;;  %v402_v20 = vstv %s1211_s6  ;;  %s1262_s20 = sld [smem:[#allocation6 + %s433_s11]]  ;;  %s471_s4 = scalar_lea.sflag [#allocation4], %s1001_s28 }
  0x79   : > { %v403_v21 = vsel %vm398_vm10, %v402_v20, %v392_v15  ;;  %v404_v22 = vsel %vm399_vm11, %v402_v20, %v393_v16  ;;  %v406_v23 = vstv %s1219_s30  ;;  %s1270_s19 = sld [smem:[#allocation7 + %s433_s11]]  ;;  %s613_s30 = sshll.u32 %s843_s15, 5 }
  0x7a   : > { %v407_v24 = vsel %vm398_vm10, %v406_v23, %v396_v18  ;;  %v408_v25 = vsel %vm399_vm11, %v406_v23, %v397_v19  ;;  %v413_v26 = vstv %s1228_s9  ;;  %s445_s10 = sld [smem:[#allocation6 + %s444_s22]]  ;;  %s487_s9 = sshll.u32 %s245_s8, 4  ;;  %s1332_s9 = int_to_ptr.vmem [resolvable:$true] %s487_s9 }
  0x7b   : > { %v414_v27 = vsel %vm409_vm12, %v413_v26, %v403_v21  ;;  %v415_v28 = vsel %vm410_vm13, %v413_v26, %v404_v22  ;;  %v417_v29 = vstv %s1236_s21  ;;  %s449_s29 = sld [smem:[#allocation7 + %s444_s22]]  ;;  %s1330_s11 = scalar_lea.hbm %s1382_s3, %s613_s30 }
  0x7c   : > { %v418_v30 = vsel %vm409_vm12, %v417_v29, %v407_v24  ;;  %v419_v31 = vsel %vm410_vm13, %v417_v29, %v408_v25  ;;  %v424_v32 = vstv %s1245_s27  ;;  %s456_s23 = sld [smem:[#allocation6 + %s455_s7]]  ;;  %s763_s27 = scalar_lea.vmem %s1332_s9, 64 }
  0x7d   : > { %v425_v33 = vsel %vm420_vm14, %v424_v32, %v414_v27  ;;  %v426_v34 = vsel %vm421_vm15, %v424_v32, %v415_v28  ;;  %v428_v35 = vstv %s1253_s26  ;;  %s460_s6 = sld [smem:[#allocation7 + %s455_s7]]  ;;  %p764_p7 = scmp.ne.s32.totalorder %s1332_s9, %s763_s27 }
  0x7e   : > { %v429_v36 = vsel %vm420_vm14, %v428_v35, %v418_v30  ;;  %v430_v37 = vsel %vm421_vm15, %v428_v35, %v419_v31  ;;  %v435_v38 = vstv %s1262_s20  ;;  %s859_s26 = smov [#allocation9]  }
  0x7f   : > { %v436_v39 = vsel %vm431_vm0, %v435_v38, %v425_v33  ;;  %v437_v40 = vsel %vm432_vm1, %v435_v38, %v426_v34  ;;  %v439_v41 = vstv %s1270_s19  ;;  %p765_p8 = pnand %p764_p7, %p1401_p3  ;;  %s767_s22 = sshll.u32 %s859_s26, 4  ;;  %s768_s22 = int_to_ptr.vmem [resolvable:$false] %s767_s22 }
  0x80   : > { %v440_v42 = vsel %vm431_vm0, %v439_v41, %v429_v36  ;;  %v441_v43 = vsel %vm432_vm1, %v439_v41, %v430_v37  ;;  %v446_v44 = vstv %s445_s10  ;;  %s769_s20 = scalar_lea.vmem %s768_s22, 128  ;;  %p770_p12 = scmp.lt.s32.totalorder %s1332_s9, %s768_s22 }
  0x81   : > { %v447_v45 = vsel %vm442_vm2, %v446_v44, %v436_v39  ;;  %v448_v46 = vsel %vm443_vm3, %v446_v44, %v437_v40  ;;  %v450_v47 = vstv %s449_s29  ;;  %p766_p9 = pneg %p765_p8  ;;  %p771_p1 = scmp.lt.s32.totalorder %s769_s20, %s763_s27 }
  0x82   : > { %v451_v48 = vsel %vm442_vm2, %v450_v47, %v440_v42  ;;  %v452_v49 = vsel %vm443_vm3, %v450_v47, %v441_v43  ;;  %v457_v50 = vstv %s456_s23 }
  0x83   : > { %v458_v51 = vsel %vm453_vm4, %v457_v50, %v447_v45  ;;  %v459_v52 = vsel %vm454_vm5, %v457_v50, %v448_v46  ;;  %v461_v53 = vstv %s460_s6  ;;  %p772_p2 = por %p771_p1, %p770_p12 }
  0x84   : > { %v462_v54 = vsel %vm453_vm4, %v461_v53, %v451_v48  ;;  %v463_v55 = vsel %vm454_vm5, %v461_v53, %v452_v49  ;;  %v464_v56 = vmul.f32 %v458_v51, %v1026_v0  ;;  %v465_v57 = vmul.f32 %v459_v52, %v1028_v1 }
  0x85   : > { %p773_p6 = pnand %p772_p2, %p766_p9 }
  0x86   : > { %v466_v58 = vadd.f32 %v464_v56, %v462_v54  ;;  %v467_v59 = vadd.f32 %v465_v57, %v463_v55 }
  0x88   : > { %468 = vst [vmem:[%s245_s8] sm:$0x3] %v466_v58  ;;  %469 = vst [vmem:[%s245_s8 + $0x2] sm:$0x3] %v467_v59 }
  0x89   : > { %776 = shalt.err (!%p773_p6)
}
  0x8a   : > { %s777_s19 = scalar_lea.hbm %s1330_s11, 64  ;;  %s781_s29 = scalar_lea.hbm %s1382_s3, 256 }
  0x8b   : > { %p778_p11 = scmp.ne.s32.totalorder %s1330_s11, %s777_s19  ;;  %p782_p0 = scmp.lt.s32.totalorder %s1330_s11, %s1382_s3 }
  0x8c   : > { %p783_p4 = scmp.lt.s32.totalorder %s781_s29, %s777_s19 }
  0x8d   : > { %p779_p5 = pnand %p778_p11, %p1401_p3 }
  0x8e   : > { %p784_p10 = por %p783_p4, %p782_p0 }
  0x8f   : > { %p780_p13 = pneg %p779_p5 }
  0x91   : > { %p785_p7 = pnand %p784_p10, %p780_p13 }
  0x93   : > { %788 = shalt.err (!%p785_p7)
}
  0x94   : > { %s860_s30 = smov 32   ;;  %s861_s8 = smov 128  }
  0x95   : > { %s862_s15 = smov 2  }
  0x96   : > { %626 = dma.vmem_to_hbm [thread:$0]  (%p1401_p3), %s1332_s9, 64, %s1330_s11, %s471_s4, %s860_s30, %s861_s8, %s862_s15  }
  0x97 PF: > { %p648_p8 = scmp.ge.s32.totalorder %s851_s17, 2  ;;  %s502_s21 = sand.u32 1, %s831_s12  }
  0x98   : > { %p1402_p9 = scmp.ne.s32.totalorder %s1393_s25, 0  ;;  %s503_s27 = scalar_lea.sflag [#allocation4], %s502_s21 }
  0x9a   : > { %p640_p12 = pnand %p648_p8, %p1402_p9 }
  0x9c   : > { %p641_p1 = pneg %p640_p12 }
  0x9e   : > { %826 = dma.done.wait (%p641_p1), %s503_s27, 64  }
  0x9f   : > { %828 = vsyncadd (%p641_p1), %s503_s27, 4294967232  ;;  %s21_s17 = sadd.s32 1, %s851_s17   ;;  %s1403_s12 = smov %s835_s13 }
  0xa0   : > { %p18_p2 = scmp.ge.s32.totalorder %s21_s17, 6   ;;  %s1404_s13 = smov %s839_s14 }
  0xa1   : > { %s1405_s14 = smov %s991_s5  ;;  %s1406_s15 = smov %s847_s16 }
  0xa2   : > { %s1407_s16 = smov %s1409_s18  ;;  %20 = sbr.rel (!%p18_p2) target bundleno = 8 (0x8), region = 86 }
  0xa7   :  { %508 = vsyncpa [#allocation3], 1 }
  0xa8   :  { %510 = vsyncpa [#allocation3 + $0x1], 1 }
  0xa9   :  { %511 = vsyncpa [#allocation4], 1 }
  0xaa   :  { %513 = vsyncpa [#allocation4 + $0x1], 1 }
  0xab   :  { %514 = vsyncpa [#allocation5], 1 }
  0xac   :  { %516 = vsyncpa [#allocation5 + $0x1], 1 }
  0xad   :  { %517 = vsyncpa [#allocation8], 1 }

</bundles_post_ra>
